<compile_context>
chip_gen: v5e
topology: v5e:2x2
jax: 0.10.0
libtpu: 0.0.40
codegen_flags: <defaults>
</compile_context>

<pallas_src>
import jax
import jax.numpy as jnp
from jax.experimental import pallas as pl
from jax.experimental.pallas import tpu as pltpu

LANE = 128      # NOTE: could round hidden/out dims to 256 on v6e/v7x (2x256x256
SUBLANE = 8     # MXU) for wide layers; 128 kept (optimal on v5e, less waste here).


def _round_up(x, m):
    return (x + m - 1) // m * m


def _vmem_limit(need_bytes):
    """Scoped-VMEM limit: actual footprint + 50% headroom, clamped to
    [32 MiB, 64 MiB] (64 MiB = v7x physical VMEM; v5e/v6e have 128 MiB)."""
    return int(min(max(int(need_bytes * 1.5), 32 * 2**20), 64 * 2**20))


def mlp_kernel(x_ref, w1_ref, b1_ref, w2_ref, b2_ref, o_ref):
    cdt = w1_ref.dtype
    # Layer 1: MXU matmul in compute dtype, f32 accumulation.
    h = jnp.dot(x_ref[...].astype(cdt), w1_ref[...],
                preferred_element_type=jnp.float32)
    # Bias + ReLU in f32 on the VPU.
    h = jnp.maximum(h + b1_ref[...], 0.0)
    # Layer 2: re-quantize activations to compute dtype, accumulate f32.
    out = jnp.dot(h.astype(cdt), w2_ref[...],
                  preferred_element_type=jnp.float32)
    o_ref[...] = (out + b2_ref[...]).astype(o_ref.dtype)


def prepare_params(w1, b1, w2, b2, *, compute_dtype=jnp.bfloat16):
    """Pad every dim to a lane multiple and cast matmul operands ONCE.

    w1: (dim_in, dim_hidden), b1: (dim_hidden,), w2: (dim_hidden, dim_out),
    b2: (dim_out,). Padding is exact (zeros propagate through ReLU and the
    second matmul; padded output lanes are sliced away after the call).
    `compute_dtype=jnp.float32` gives bit-closer-to-torch results at 2x the
    weight DMA.
    """
    dim_in, dim_hidden = w1.shape
    dim_out = w2.shape[1]
    din_p = _round_up(dim_in, LANE)
    dh_p = _round_up(dim_hidden, LANE)
    dout_p = _round_up(dim_out, LANE)

    w1_p = jnp.zeros((din_p, dh_p), compute_dtype).at[:dim_in, :dim_hidden].set(
        w1.astype(compute_dtype))
    b1_p = jnp.zeros((1, dh_p), jnp.float32).at[:, :dim_hidden].set(
        b1.reshape(1, dim_hidden).astype(jnp.float32))
    w2_p = jnp.zeros((dh_p, dout_p), compute_dtype).at[:dim_hidden, :dim_out].set(
        w2.astype(compute_dtype))
    b2_p = jnp.zeros((1, dout_p), jnp.float32).at[:, :dim_out].set(
        b2.reshape(1, dim_out).astype(jnp.float32))

    return {"w1": w1_p, "b1": b1_p, "w2": w2_p, "b2": b2_p,
            "dim_in": dim_in, "dim_hidden": dim_hidden, "dim_out": dim_out}


def mlp_forward(x_nchw, params, *, block_b=256, out_dtype=jnp.float32):
    """x_nchw: (B, C, H, W). params: output of prepare_params (pre-padded).

    Returns (B, dim_out) in `out_dtype`.
    """
    w1_p, b1_p, w2_p, b2_p = params["w1"], params["b1"], params["w2"], params["b2"]
    dim_in, dim_out = params["dim_in"], params["dim_out"]
    din_p, dh_p = w1_p.shape
    dout_p = w2_p.shape[1]
    cdt = w1_p.dtype
    cbytes = jnp.dtype(cdt).itemsize
    obytes = jnp.dtype(out_dtype).itemsize

    B = x_nchw.shape[0]
    flat_in = x_nchw.shape[1] * x_nchw.shape[-2] * x_nchw.shape[-1]
    assert flat_in == dim_in, (flat_in, dim_in)
    x_flat = x_nchw.reshape(-1, flat_in)  # same semantics as torch .view

    # ---- batch tiling ----------------------------------------------------
    # Pad batch only to a sublane multiple; when tiling, force an even tile
    # count so megacore ("parallel") sharding balances v7x's 2 TensorCores.
    bp0 = _round_up(B, SUBLANE)
    if bp0 <= block_b:
        n_tiles, tb = 1, bp0
    else:
        n_tiles = pl.cdiv(bp0, block_b)
        if n_tiles % 2:
            n_tiles += 1
        tb = _round_up(pl.cdiv(bp0, n_tiles), SUBLANE)
    bp = tb * n_tiles

    # ---- activation padding (skipped when already aligned) ----------------
    pad_x = (bp != B) or (din_p != dim_in)
    if pad_x:
        # Pad + cast to compute dtype in one copy.
        x_in = jnp.zeros((bp, din_p), cdt).at[:B, :dim_in].set(x_flat.astype(cdt))
        xbytes = cbytes
    else:
        x_in = x_flat  # cast to compute dtype on the fly inside the kernel
        xbytes = jnp.dtype(x_flat.dtype).itemsize

    weight_bytes = (din_p * dh_p * cbytes + dh_p * 4
                    + dh_p * dout_p * cbytes + dout_p * 4)
    out_shape = jax.ShapeDtypeStruct((bp, dout_p), out_dtype)

    if n_tiles == 1:
        # Small batch: whole (padded) problem resident in VMEM, no grid,
        # no pipeline prologue/epilogue overhead.
        # TODO(synk): add a K-axis (contraction) grid with an f32 accumulator
        # for layers too wide to keep weights resident (v7x has only 64 MiB).
        need = (bp * din_p * xbytes + weight_bytes
                + bp * dh_p * 4 + bp * dout_p * 4 + bp * dout_p * obytes)
        out_p = pl.pallas_call(
            mlp_kernel,
            out_shape=out_shape,
            in_specs=[pl.BlockSpec(memory_space=pltpu.MemorySpace.VMEM)] * 5,
            out_specs=pl.BlockSpec(memory_space=pltpu.MemorySpace.VMEM),
            compiler_params=pltpu.CompilerParams(
                vmem_limit_bytes=_vmem_limit(need)),
        )(x_in, w1_p, b1_p, w2_p, b2_p)
    else:
        # Large batch: tile rows over a parallel grid axis; weights/biases are
        # constant-index blocks kept resident and single-buffered.
        resident = dict(pipeline_mode=pl.Buffered(1))
        need = (2 * tb * din_p * xbytes + weight_bytes
                + tb * dh_p * 4 + tb * dout_p * 4 + 2 * tb * dout_p * obytes)
        out_p = pl.pallas_call(
            mlp_kernel,
            out_shape=out_shape,
            grid=(n_tiles,),
            in_specs=[
                pl.BlockSpec((tb, din_p), lambda i: (i, 0)),
                pl.BlockSpec((din_p, dh_p), lambda i: (0, 0), **resident),
                pl.BlockSpec((1, dh_p), lambda i: (0, 0), **resident),
                pl.BlockSpec((dh_p, dout_p), lambda i: (0, 0), **resident),
                pl.BlockSpec((1, dout_p), lambda i: (0, 0), **resident),
            ],
            out_specs=pl.BlockSpec((tb, dout_p), lambda i: (i, 0)),
            compiler_params=pltpu.CompilerParams(
                dimension_semantics=("parallel",),
                vmem_limit_bytes=_vmem_limit(need)),
        )(x_in, w1_p, b1_p, w2_p, b2_p)

    # Strip batch / lane padding.
    return out_p[:B, :dim_out]


def init_params(key, dim_in, dim_hidden, dim_out):
    """Mimics nn.Linear's uniform(-1/sqrt(fan_in), 1/sqrt(fan_in)) init."""
    k1, k2, k3, k4 = jax.random.split(key, 4)
    bound1 = 1.0 / jnp.sqrt(dim_in)
    bound2 = 1.0 / jnp.sqrt(dim_hidden)
    # Stored as (in, out) so the kernel computes x @ W (== torch x @ W.T).
    w1 = jax.random.uniform(k1, (dim_in, dim_hidden), jnp.float32, -bound1, bound1)
    b1 = jax.random.uniform(k2, (dim_hidden,), jnp.float32, -bound1, bound1)
    w2 = jax.random.uniform(k3, (dim_hidden, dim_out), jnp.float32, -bound2, bound2)
    b2 = jax.random.uniform(k4, (dim_out,), jnp.float32, -bound2, bound2)
    return w1, b1, w2, b2


if __name__ == "__main__":
    key = jax.random.PRNGKey(0)
    kx, kp = jax.random.split(key)

    # Small shapes consistent with the module's forward:
    # x: (B=2, C=4, H=16, W=16) -> dim_in = 4*16*16 = 1024
    B, C, H, W = 2, 4, 16, 16
    dim_in = C * H * W
    dim_hidden = 32
    dim_out = 10

    x = jax.random.normal(kx, (B, C, H, W), dtype=jnp.float32)
    w1, b1, w2, b2 = init_params(kp, dim_in, dim_hidden, dim_out)

    # Pad + cast the weights ONCE (hoisted out of the per-forward path).
    params = prepare_params(w1, b1, w2, b2)

    out = jax.block_until_ready(mlp_forward(x, params))
    assert out.shape == (B, dim_out)

    # Reference in plain JAX with the same bf16 quantization of x/w1/h/w2
    # (f32 accumulation), so only MXU-vs-XLA rounding differences remain.
    x_flat = x.reshape(B, dim_in)
    xq = x_flat.astype(jnp.bfloat16).astype(jnp.float32)
    w1q = w1.astype(jnp.bfloat16).astype(jnp.float32)
    w2q = w2.astype(jnp.bfloat16).astype(jnp.float32)
    h_ref = jnp.maximum(xq @ w1q + b1.reshape(1, -1), 0.0)
    hq = h_ref.astype(jnp.bfloat16).astype(jnp.float32)
    ref = hq @ w2q + b2.reshape(1, -1)
    assert jnp.allclose(out, ref, atol=2e-2, rtol=2e-2), float(
        jnp.max(jnp.abs(out - ref)))

    print("KERNEL_OK")
</pallas_src>

<mosaic_0001>
module attributes {stable_mosaic.version = 11 : i64} {
  func.func @mlp_kernel(%arg0: memref<8x1024xbf16, #tpu.memory_space<vmem>>, %arg1: memref<1024x128xbf16, #tpu.memory_space<vmem>>, %arg2: memref<1x128xf32, #tpu.memory_space<vmem>>, %arg3: memref<128x128xbf16, #tpu.memory_space<vmem>>, %arg4: memref<1x128xf32, #tpu.memory_space<vmem>>, %arg5: memref<8x128xf32, #tpu.memory_space<vmem>>) attributes {dimension_semantics = [], scalar_prefetch = 0 : i64, scratch_operands = 0 : i64, tpu.core_type = #tpu.core_type<tc>} {
    %c0 = arith.constant 0 : index
    %c0_0 = arith.constant 0 : index
    %0 = vector.load %arg0[%c0, %c0_0] : memref<8x1024xbf16, #tpu.memory_space<vmem>>, vector<8x1024xbf16>
    %c0_1 = arith.constant 0 : index
    %c0_2 = arith.constant 0 : index
    %1 = vector.load %arg1[%c0_1, %c0_2] : memref<1024x128xbf16, #tpu.memory_space<vmem>>, vector<1024x128xbf16>
    %cst = arith.constant dense<0.000000e+00> : vector<8x128xf32>
    %2 = tpu.matmul %0, %1, %cst {dimension_numbers = #tpu.dot_dimension_numbers<[1], [0], [0], [1], [0, 0, 1, 1], [], []>} : vector<8x1024xbf16>, vector<1024x128xbf16>, vector<8x128xf32> -> vector<8x128xf32>
    %c0_3 = arith.constant 0 : index
    %c0_4 = arith.constant 0 : index
    %3 = vector.load %arg2[%c0_3, %c0_4] : memref<1x128xf32, #tpu.memory_space<vmem>>, vector<1x128xf32>
    %4 = vector.broadcast %3 : vector<1x128xf32> to vector<8x128xf32>
    %5 = arith.addf %2, %4 : vector<8x128xf32>
    %cst_5 = arith.constant 0.000000e+00 : f32
    %6 = vector.broadcast %cst_5 : f32 to vector<8x128xf32>
    %7 = arith.maximumf %5, %6 : vector<8x128xf32>
    %8 = arith.truncf %7 : vector<8x128xf32> to vector<8x128xbf16>
    %c0_6 = arith.constant 0 : index
    %c0_7 = arith.constant 0 : index
    %9 = vector.load %arg3[%c0_6, %c0_7] : memref<128x128xbf16, #tpu.memory_space<vmem>>, vector<128x128xbf16>
    %cst_8 = arith.constant dense<0.000000e+00> : vector<8x128xf32>
    %10 = tpu.matmul %8, %9, %cst_8 {dimension_numbers = #tpu.dot_dimension_numbers<[1], [0], [0], [1], [0, 0, 1, 1], [], []>} : vector<8x128xbf16>, vector<128x128xbf16>, vector<8x128xf32> -> vector<8x128xf32>
    %c0_9 = arith.constant 0 : index
    %c0_10 = arith.constant 0 : index
    %11 = vector.load %arg4[%c0_9, %c0_10] : memref<1x128xf32, #tpu.memory_space<vmem>>, vector<1x128xf32>
    %12 = vector.broadcast %11 : vector<1x128xf32> to vector<8x128xf32>
    %13 = arith.addf %10, %12 : vector<8x128xf32>
    %c0_11 = arith.constant 0 : index
    %c0_12 = arith.constant 0 : index
    %14 = vector.load %arg5[%c0_11, %c0_12] : memref<8x128xf32, #tpu.memory_space<vmem>>, vector<8x128xf32>
    tpu.vector_store %arg5[%c0_11, %c0_12], %13 {strides = array<i32>} : memref<8x128xf32, #tpu.memory_space<vmem>>, vector<8x128xf32>,
    return
  }
}

</mosaic_0001>

<bundles_post_ra>
// kernel: tpu_custom_call.1
= control target key start
LH: loop header
LB: loop body
LE: loop exit
PB: predicated region body
PF: predicated region fallthrough
CT: control target
= control target key end

     0   :  { %10 = vsyncpa [#allocation3], 0  ;;  %s1344_s0 = inlined_call_operand.hbm [shape: bf16[8,1024], index: 0, kind: input, shape index: {}]   ;;  %s1345_s1 = inlined_call_operand.hbm [shape: bf16[1024,128], index: 1, kind: input, shape index: {}]   ;;  %s1346_s2 = inlined_call_operand.vmem [shape: f32[1,128], index: 2, kind: input, shape index: {}]   ;;  %s1347_s3 = inlined_call_operand.hbm [shape: bf16[128,128], index: 3, kind: input, shape index: {}]   ;;  %s1348_s4 = inlined_call_operand.vmem [shape: f32[1,128], index: 4, kind: input, shape index: {}]   ;;  %s1349_s5 = inlined_call_operand.hbm [shape: f32[8,128], index: 5, kind: output, shape index: {}]  }
   0x1   :  { %11 = vsyncpa [#allocation6], 0  ;;  %s28_s20 = sshll.u32 %s1345_s1, 4  ;;  %s29_s20 = int_to_ptr.hbm [resolvable:$true] %s28_s20 }
   0x2   :  { %12 = vsyncpa [#allocation4], 0  ;;  %s1290_s21 = smov [#allocation5]   ;;  %s18_s25 = sshll.u32 %s1344_s0, 4  ;;  %s19_s25 = int_to_ptr.hbm [resolvable:$true] %s18_s25 }
   0x3   :  { %s30_s22 = sshll.u32 %s1290_s21, 4  ;;  %s1291_s26 = smov 64   ;;  %s31_s22 = int_to_ptr.vmem [resolvable:$true] %s30_s22 }
   0x4   :  { %s1292_s27 = smov 4   ;;  %s1293_s28 = smov [#allocation2]  }
   0x5   :  { %36 = dma.hbm_to_vmem [thread:$0]  %s29_s20, 8192, %s31_s22, [#allocation6], %s1291_s26, %s1291_s26, %s1292_s27  }
   0x6   :  { %s20_s29 = sshll.u32 %s1293_s28, 4  ;;  %s43_s7 = sshll.u32 %s1347_s3, 4  ;;  %s21_s29 = int_to_ptr.vmem [resolvable:$true] %s20_s29  ;;  %s44_s7 = int_to_ptr.hbm [resolvable:$true] %s43_s7 }
   0x7   :  { %23 = dma.hbm_to_vmem [thread:$0]  %s19_s25, 512, %s21_s29, [#allocation3]  }
   0x8   :  { %s1294_s1 = smov [#allocation7]  }
   0x9   :  { %s45_s8 = sshll.u32 %s1294_s1, 4  ;;  %s46_s8 = int_to_ptr.vmem [resolvable:$true] %s45_s8 }
   0xa   :  { %51 = dma.hbm_to_vmem [thread:$0]  %s44_s7, 1024, %s46_s8, [#allocation6], %s1291_s26, %s1291_s26, %s1292_s27  }
   0xb   :  { %1284 = dma.done.wait [#allocation3], 512  }
   0xc   :  { %1285 = vsyncadd [#allocation3], 4294966784 }
   0xd   :  { %1286 = dma.done.wait [#allocation6], 9216  }
   0xe   :  { %1287 = vsyncadd [#allocation6], 4294958080  ;;  %v1115_v0 = vld [vmem:[#allocation5 + $0x38] sm:$0xff]  ;;  %v1114_v4 = vld [vmem:[#allocation5 + $0x30] sm:$0xff]  ;;  %s1295_s10 = smov [#allocation8]   ;;  %s809_s14 = sshll.u32 %s1349_s5, 4  ;;  %s810_s14 = int_to_ptr.hbm [resolvable:$true] %s809_s14 }
   0xf   :  { %v1123_v1 = vld [vmem:[#allocation5 + $0x78] sm:$0xff]  ;;  %614 = vmatpush.bf16.msra.mxu0 %v1115_v0  ;;  %v1122_v5 = vld [vmem:[#allocation5 + $0x70] sm:$0xff]  ;;  %v1113_v8 = vld [vmem:[#allocation5 + $0x28] sm:$0xff]  ;;  %s807_s11 = sshll.u32 %s1295_s10, 4  ;;  %s808_s11 = int_to_ptr.vmem [resolvable:$true] %s807_s11 }
  0x10   :  { %v1131_v2 = vld [vmem:[#allocation5 + $0xb8] sm:$0xff]  ;;  %627 = vmatpush.bf16.msra.mxu1 %v1123_v1  ;;  %v1130_v6 = vld [vmem:[#allocation5 + $0xb0] sm:$0xff]  ;;  %v1121_v9 = vld [vmem:[#allocation5 + $0x68] sm:$0xff] }
  0x11   :  { %v1139_v3 = vld [vmem:[#allocation5 + $0xf8] sm:$0xff]  ;;  %640 = vmatpush.bf16.msra.mxu2 %v1131_v2  ;;  %v1138_v7 = vld [vmem:[#allocation5 + $0xf0] sm:$0xff]  ;;  %v1129_v10 = vld [vmem:[#allocation5 + $0xa8] sm:$0xff] }
  0x12   :  { %653 = vmatpush.bf16.msra.mxu3 %v1139_v3  ;;  %v1137_v11 = vld [vmem:[#allocation5 + $0xe8] sm:$0xff]  ;;  %v1112_v12 = vld [vmem:[#allocation5 + $0x20] sm:$0xff]  ;;  %v1111_v16 = vld [vmem:[#allocation5 + $0x18] sm:$0xff] }
  0x13   :  { %615 = vmatpush.bf16.msra.mxu0 %v1114_v4  ;;  %v1120_v13 = vld [vmem:[#allocation5 + $0x60] sm:$0xff]  ;;  %v1119_v17 = vld [vmem:[#allocation5 + $0x58] sm:$0xff]  ;;  %v1110_v20 = vld [vmem:[#allocation5 + $0x10] sm:$0xff] }
  0x14   :  { %628 = vmatpush.bf16.msra.mxu1 %v1122_v5  ;;  %v1128_v14 = vld [vmem:[#allocation5 + $0xa0] sm:$0xff]  ;;  %v1127_v18 = vld [vmem:[#allocation5 + $0x98] sm:$0xff]  ;;  %v1118_v21 = vld [vmem:[#allocation5 + $0x50] sm:$0xff] }
  0x15   :  { %641 = vmatpush.bf16.msra.mxu2 %v1130_v6  ;;  %v1136_v15 = vld [vmem:[#allocation5 + $0xe0] sm:$0xff]  ;;  %v1135_v19 = vld [vmem:[#allocation5 + $0xd8] sm:$0xff]  ;;  %v1126_v22 = vld [vmem:[#allocation5 + $0x90] sm:$0xff] }
  0x16   :  { %654 = vmatpush.bf16.msra.mxu3 %v1138_v7  ;;  %v1134_v23 = vld [vmem:[#allocation5 + $0xd0] sm:$0xff]  ;;  %v1109_v24 = vld [vmem:[#allocation5 + $0x8] sm:$0xff]  ;;  %v66_v29 = vld [vmem:[#allocation2] sm:$0xff] }
  0x17   :  { %616 = vmatpush.bf16.msra.mxu0 %v1113_v8  ;;  %v1117_v25 = vld [vmem:[#allocation5 + $0x48] sm:$0xff]  ;;  %v1108_v30 = vld [vmem:[#allocation5] sm:$0xff]  ;;  %v206_v33 = vunpack.c.l.b16 %v66_v29  ;;  %v207_v37 = vunpack.c.h.b16 %v66_v29  ;;  %v1147_v38 = vld [vmem:[#allocation5 + $0x138] sm:$0xff] }
  0x18   :  { %629 = vmatpush.bf16.msra.mxu1 %v1121_v9  ;;  %v1125_v26 = vld [vmem:[#allocation5 + $0x88] sm:$0xff]  ;;  %v1116_v31 = vld [vmem:[#allocation5 + $0x40] sm:$0xff]  ;;  %v1155_v39 = vld [vmem:[#allocation5 + $0x178] sm:$0xff] }
  0x19   :  { %642 = vmatpush.bf16.msra.mxu2 %v1129_v10  ;;  %v1133_v27 = vld [vmem:[#allocation5 + $0xc8] sm:$0xff]  ;;  %v1124_v34 = vld [vmem:[#allocation5 + $0x80] sm:$0xff]  ;;  %v1163_v40 = vld [vmem:[#allocation5 + $0x1b8] sm:$0xff]  ;;  %v214_v43 = vpack.c.b16 %v206_v33, %v206_v33  ;;  %v215_v45 = vpack.c.b16 %v207_v37, %v207_v37 }
  0x1a   :  { %655 = vmatpush.bf16.msra.mxu3 %v1137_v11  ;;  %v67_v28 = vld [vmem:[#allocation2 + $0x8] sm:$0xff]  ;;  %v1132_v35 = vld [vmem:[#allocation5 + $0xc0] sm:$0xff]  ;;  %v1171_v41 = vld [vmem:[#allocation5 + $0x1f8] sm:$0xff] }
  0x1b   :  { %617 = vmatpush.bf16.msra.mxu0 %v1112_v12  ;;  %v208_v32 = vunpack.c.l.b16 %v67_v28  ;;  %v209_v36 = vunpack.c.h.b16 %v67_v28  ;;  %v1146_v46 = vld [vmem:[#allocation5 + $0x130] sm:$0xff]  ;;  %v1145_v50 = vld [vmem:[#allocation5 + $0x128] sm:$0xff]  ;;  %v1144_v54 = vld [vmem:[#allocation5 + $0x120] sm:$0xff] }
  0x1c   :  { %630 = vmatpush.bf16.msra.mxu1 %v1120_v13  ;;  %v1154_v47 = vld [vmem:[#allocation5 + $0x170] sm:$0xff]  ;;  %v1153_v51 = vld [vmem:[#allocation5 + $0x168] sm:$0xff]  ;;  %v1152_v55 = vld [vmem:[#allocation5 + $0x160] sm:$0xff] }
  0x1d   :  { %643 = vmatpush.bf16.msra.mxu2 %v1128_v14  ;;  %v216_v42 = vpack.c.b16 %v208_v32, %v208_v32  ;;  %v217_v44 = vpack.c.b16 %v209_v36, %v209_v36  ;;  %v1162_v48 = vld [vmem:[#allocation5 + $0x1b0] sm:$0xff]  ;;  %v1161_v52 = vld [vmem:[#allocation5 + $0x1a8] sm:$0xff]  ;;  %v1160_v56 = vld [vmem:[#allocation5 + $0x1a0] sm:$0xff] }
  0x1e   :  { %656 = vmatpush.bf16.msra.mxu3 %v1136_v15  ;;  %v1170_v49 = vld [vmem:[#allocation5 + $0x1f0] sm:$0xff]  ;;  %v1169_v53 = vld [vmem:[#allocation5 + $0x1e8] sm:$0xff]  ;;  %v1168_v57 = vld [vmem:[#allocation5 + $0x1e0] sm:$0xff] }
  0x1f   :  { %618 = vmatpush.bf16.msra.mxu0 %v1111_v16  ;;  %v1143_v58 = vld [vmem:[#allocation5 + $0x118] sm:$0xff]  ;;  %v1142_v62 = vld [vmem:[#allocation5 + $0x110] sm:$0xff]  ;;  %v1141_v2 = vld [vmem:[#allocation5 + $0x108] sm:$0xff] }
  0x20   :  { %631 = vmatpush.bf16.msra.mxu1 %v1119_v17  ;;  %v1151_v59 = vld [vmem:[#allocation5 + $0x158] sm:$0xff]  ;;  %v1150_v63 = vld [vmem:[#allocation5 + $0x150] sm:$0xff]  ;;  %v1149_v3 = vld [vmem:[#allocation5 + $0x148] sm:$0xff] }
  0x21   :  { %644 = vmatpush.bf16.msra.mxu2 %v1127_v18  ;;  %v1159_v60 = vld [vmem:[#allocation5 + $0x198] sm:$0xff]  ;;  %v1158_v0 = vld [vmem:[#allocation5 + $0x190] sm:$0xff]  ;;  %v1157_v5 = vld [vmem:[#allocation5 + $0x188] sm:$0xff] }
  0x22   :  { %657 = vmatpush.bf16.msra.mxu3 %v1135_v19  ;;  %v1167_v61 = vld [vmem:[#allocation5 + $0x1d8] sm:$0xff]  ;;  %v1166_v1 = vld [vmem:[#allocation5 + $0x1d0] sm:$0xff]  ;;  %v1165_v6 = vld [vmem:[#allocation5 + $0x1c8] sm:$0xff] }
  0x23   :  { %619 = vmatpush.bf16.msra.mxu0 %v1110_v20  ;;  %v68_v4 = vld [vmem:[#allocation2 + $0x10] sm:$0xff]  ;;  %v69_v7 = vld [vmem:[#allocation2 + $0x18] sm:$0xff]  ;;  %v1140_v10 = vld [vmem:[#allocation5 + $0x100] sm:$0xff] }
  0x24   :  { %632 = vmatpush.bf16.msra.mxu1 %v1118_v21  ;;  %v210_v8 = vunpack.c.l.b16 %v68_v4  ;;  %v211_v9 = vunpack.c.h.b16 %v68_v4  ;;  %v1148_v11 = vld [vmem:[#allocation5 + $0x140] sm:$0xff]  ;;  %v212_v12 = vunpack.c.l.b16 %v69_v7  ;;  %v213_v13 = vunpack.c.h.b16 %v69_v7  ;;  %v1179_v20 = vld [vmem:[#allocation7 + $0x38] sm:$0xff]  ;;  %v1178_v21 = vld [vmem:[#allocation7 + $0x30] sm:$0xff] }
  0x25   :  { %645 = vmatpush.bf16.msra.mxu2 %v1126_v22  ;;  %v1156_v14 = vld [vmem:[#allocation5 + $0x180] sm:$0xff]  ;;  %v1177_v22 = vld [vmem:[#allocation7 + $0x28] sm:$0xff] }
  0x26   :  { %658 = vmatpush.bf16.msra.mxu3 %v1134_v23  ;;  %v1164_v15 = vld [vmem:[#allocation5 + $0x1c0] sm:$0xff]  ;;  %v218_v16 = vpack.c.b16 %v210_v8, %v210_v8  ;;  %v219_v17 = vpack.c.b16 %v211_v9, %v211_v9  ;;  %v220_v18 = vpack.c.b16 %v212_v12, %v212_v12  ;;  %v221_v19 = vpack.c.b16 %v213_v13, %v213_v13  ;;  %v1173_v28 = vld [vmem:[#allocation7 + $0x8] sm:$0xff] }
  0x27   :  { %620 = vmatpush.bf16.msra.mxu0 %v1109_v24  ;;  %v1176_v23 = vld [vmem:[#allocation7 + $0x20] sm:$0xff]  ;;  %v1175_v24 = vld [vmem:[#allocation7 + $0x18] sm:$0xff] }
  0x28   :  { %633 = vmatpush.bf16.msra.mxu1 %v1117_v25  ;;  %v1172_v32 = vld [vmem:[#allocation7] sm:$0xff] }
  0x29   :  { %646 = vmatpush.bf16.msra.mxu2 %v1125_v26  ;;  %v1174_v26 = vld [vmem:[#allocation7 + $0x10] sm:$0xff] }
  0x2a   :  { %659 = vmatpush.bf16.msra.mxu3 %v1133_v27 }
  0x2b   :  { %621 = vmatpush.bf16.msra.mxu0 %v1108_v30 }
  0x2c   :  { %634 = vmatpush.bf16.msra.mxu1 %v1116_v31 }
  0x2d   :  { %647 = vmatpush.bf16.msra.mxu2 %v1124_v34  ;;  %v1186_v34 = vld [vmem:[%s1346_s2] ss:$0 sm:$0xff] }
  0x2e   :  { %660 = vmatpush.bf16.msra.mxu3 %v1132_v35  ;;  %622 = vmatmul.bf16.vlgmr.msra.gmra.mxu0 %v214_v43 }
  0x2f   :  { %666 = vmatpush.bf16.msrb.mxu0 %v1147_v38  ;;  %635 = vmatmul.bf16.vlgmr.msra.gmra.mxu1 %v215_v45 }
  0x30   :  { %679 = vmatpush.bf16.msrb.mxu1 %v1155_v39  ;;  %648 = vmatmul.bf16.vlgmr.msra.gmra.mxu2 %v216_v42 }
  0x31   :  { %692 = vmatpush.bf16.msrb.mxu2 %v1163_v40  ;;  %661 = vmatmul.bf16.vlgmr.msra.gmra.mxu3 %v217_v44 }
  0x32   :  { %705 = vmatpush.bf16.msrb.mxu3 %v1171_v41 }
  0x33   :  { %667 = vmatpush.bf16.msrb.mxu0 %v1146_v46 }
  0x34   :  { %680 = vmatpush.bf16.msrb.mxu1 %v1154_v47 }
  0x35   :  { %693 = vmatpush.bf16.msrb.mxu2 %v1162_v48 }
  0x36   :  { %706 = vmatpush.bf16.msrb.mxu3 %v1170_v49 }
  0x37   :  { %668 = vmatpush.bf16.msrb.mxu0 %v1145_v50 }
  0x38   :  { %681 = vmatpush.bf16.msrb.mxu1 %v1153_v51 }
  0x39   :  { %694 = vmatpush.bf16.msrb.mxu2 %v1161_v52 }
  0x3a   :  { %707 = vmatpush.bf16.msrb.mxu3 %v1169_v53 }
  0x3b   :  { %669 = vmatpush.bf16.msrb.mxu0 %v1144_v54 }
  0x3c   :  { %682 = vmatpush.bf16.msrb.mxu1 %v1152_v55  ;;  %v1187_v55 = vld [vmem:[%s1348_s4] ss:$0 sm:$0xff] }
  0x3d   :  { %695 = vmatpush.bf16.msrb.mxu2 %v1160_v56 }
  0x3e   :  { %708 = vmatpush.bf16.msrb.mxu3 %v1168_v57 }
  0x3f   :  { %670 = vmatpush.bf16.msrb.mxu0 %v1143_v58 }
  0x40   :  { %683 = vmatpush.bf16.msrb.mxu1 %v1151_v59 }
  0x41   :  { %696 = vmatpush.bf16.msrb.mxu2 %v1159_v60 }
  0x42   :  { %709 = vmatpush.bf16.msrb.mxu3 %v1167_v61 }
  0x43   :  { %671 = vmatpush.bf16.msrb.mxu0 %v1142_v62 }
  0x44   :  { %684 = vmatpush.bf16.msrb.mxu1 %v1150_v63 }
  0x45   :  { %697 = vmatpush.bf16.msrb.mxu2 %v1158_v0 }
  0x46   :  { %710 = vmatpush.bf16.msrb.mxu3 %v1166_v1 }
  0x47   :  { %672 = vmatpush.bf16.msrb.mxu0 %v1141_v2 }
  0x48   :  { %685 = vmatpush.bf16.msrb.mxu1 %v1149_v3 }
  0x49   :  { %698 = vmatpush.bf16.msrb.mxu2 %v1157_v5 }
  0x4a   :  { %711 = vmatpush.bf16.msrb.mxu3 %v1165_v6 }
  0x4b   :  { %673 = vmatpush.bf16.msrb.mxu0 %v1140_v10 }
  0x4c   :  { %686 = vmatpush.bf16.msrb.mxu1 %v1148_v11 }
  0x4d   :  { %699 = vmatpush.bf16.msrb.mxu2 %v1156_v14 }
  0x4e   :  { %712 = vmatpush.bf16.msrb.mxu3 %v1164_v15  ;;  %674 = vmatmul.bf16.vlgmr.msrb.gmra.mxu0 %v218_v16 }
  0x4f   :  { %687 = vmatmul.bf16.vlgmr.msrb.gmra.mxu1 %v219_v17  ;;  %788 = vmatpush.bf16.msra.mxu0 %v1179_v20 }
  0x50   :  { %700 = vmatmul.bf16.vlgmr.msrb.gmra.mxu2 %v220_v18 }
  0x51   :  { %713 = vmatmul.bf16.vlgmr.msrb.gmra.mxu3 %v221_v19 }
  0x53   :  { %789 = vmatpush.bf16.msra.mxu0 %v1178_v21 }
  0x57   :  { %790 = vmatpush.bf16.msra.mxu0 %v1177_v22 }
  0x5b   :  { %791 = vmatpush.bf16.msra.mxu0 %v1176_v23 }
  0x5f   :  { %792 = vmatpush.bf16.msra.mxu0 %v1175_v24 }
  0x63   :  { %793 = vmatpush.bf16.msra.mxu0 %v1174_v26 }
  0x67   :  { %794 = vmatpush.bf16.msra.mxu0 %v1173_v28 }
  0x6b   :  { %795 = vmatpush.bf16.msra.mxu0 %v1172_v32 }
  0xab   :  { %v623_v25 = vpop.f32.mrf.mxu0 }
  0xac   :  { %v636_v27 = vpop.f32.mrf.mxu1  ;;  %v624_v37 = vadd.f32 %v1186_v34, %v623_v25 }
  0xae   :  { %v637_v38 = vadd.f32 %v636_v27, %v624_v37 }
  0xb3   :  { %v649_v29 = vpop.f32.mrf.mxu2  ;;  %v625_v31 = vpop.f32.mrf.mxu0 }
  0xb4   :  { %v662_v30 = vpop.f32.mrf.mxu3  ;;  %v638_v33 = vpop.f32.mrf.mxu1  ;;  %v650_v39 = vadd.f32 %v649_v29, %v637_v38 }
  0xb6   :  { %v663_v40 = vadd.f32 %v662_v30, %v650_v39 }
  0xbb   :  { %v651_v35 = vpop.f32.mrf.mxu2 }
  0xbc   :  { %v664_v36 = vpop.f32.mrf.mxu3 }
  0xcb   :  { %v675_v41 = vpop.f32.mrf.mxu0 }
  0xcc   :  { %v688_v42 = vpop.f32.mrf.mxu1  ;;  %v676_v43 = vadd.f32 %v675_v41, %v663_v40 }
  0xce   :  { %v689_v44 = vadd.f32 %v688_v42, %v676_v43 }
  0xd3   :  { %v701_v45 = vpop.f32.mrf.mxu2  ;;  %v677_v48 = vpop.f32.mrf.mxu0 }
  0xd4   :  { %v714_v46 = vpop.f32.mrf.mxu3  ;;  %v702_v47 = vadd.f32 %v701_v45, %v689_v44  ;;  %v690_v49 = vpop.f32.mrf.mxu1 }
  0xd6   :  { %v715_v50 = vadd.f32 %v714_v46, %v702_v47 }
  0xd8   :  { %v718_v51 = vmax.f32 %v715_v50, 0.0 }
  0xda   :  { %v719_v52 = vpack.c.bf16 %v718_v51, %v718_v51 }
  0xdb   :  { %v703_v53 = vpop.f32.mrf.mxu2 }
  0xdc   :  { %v716_v54 = vpop.f32.mrf.mxu3  ;;  %796 = vmatmul.bf16.vlgmr.msra.gmra.mxu0 %v719_v52 }
 0x159   :  { %v797_v56 = vpop.f32.mrf.mxu0 }
 0x15a   :  { %v798_v57 = vadd.f32 %v1187_v55, %v797_v56 }
 0x15c   :  { %801 = vst [vmem:[#allocation8] sm:$0xff] %v798_v57 }
 0x15d   :  { %812 = dma.vmem_to_hbm [thread:$0]  %s808_s11, 128, %s810_s14, [#allocation4]  }
 0x161   :  { %v799_v58 = vpop.f32.mrf.mxu0 }
 0x162   :  { %1288 = dma.done.wait [#allocation4], 128  }
 0x163   :  { %1289 = vsyncadd [#allocation4], 4294967168 }
 0x164   :  { %817 = vsyncpa [#allocation3], 1 }
 0x165   :  { %818 = vsyncpa [#allocation6], 1 }
 0x166   :  { %819 = vsyncpa [#allocation4], 1 }

</bundles_post_ra>
